<compile_context>
chip_gen: v6e
topology: v6e:2x2x1
jax: 0.10.0
libtpu: 0.0.40
codegen_flags: <defaults>
</compile_context>

<pallas_src>
import functools

import jax
import jax.numpy as jnp
from jax import lax
from jax.experimental import pallas as pl
from jax.experimental.pallas import tpu as pltpu

_EPS = 1e-12  # eps of torch.nn.functional.normalize


def _nt_xent_kernel(q_ref, p_ref, k_ref, loss_ref,
                    q_mx_ref, post_ref, acc_ref, *, tile, temperature):
    """One (row-tile, col-tile) step of the NT-Xent loss.

    q_ref    : (tile, Dp) raw rows of reps = [z_i; z_j] for this row tile
    p_ref    : (tile, Dp) raw rows of the partner half (positive pairs)
    k_ref    : (tile, Dp) raw rows of reps for the current column tile
    loss_ref : (tile, 1)  per-row loss (written on the last column step)
    q_mx_ref : (tile, Dp) scratch: normalized, 1/sqrt(T)-scaled rows (MXU feed)
    post_ref : (tile, 1)  scratch: positives / T (kept in f32)
    acc_ref  : (tile, 1)  scratch: running row-sum of exp((sim - 1)/T)
    """
    qi = pl.program_id(0)
    kj = pl.program_id(1)

    inv_temp = 1.0 / float(temperature)
    scale = inv_temp ** 0.5          # fold 1/T into both matmul operands
    eps2 = jnp.float32(_EPS * _EPS)

    def _normalize_scale(x):
        x = x.astype(jnp.float32)
        ssq = jnp.sum(x * x, axis=1, keepdims=True)
        # x / max(||x||, eps) * sqrt(1/T), via rsqrt (EUP) instead of div/sqrt.
        return x * (lax.rsqrt(jnp.maximum(ssq, eps2)) * scale)

    @pl.when(kj == 0)
    def _init():
        qs = _normalize_scale(q_ref[...])               # (tile, Dp)
        ps = _normalize_scale(p_ref[...])               # partner rows
        post_ref[...] = jnp.sum(qs * ps, axis=1, keepdims=True)   # = pos / T
        q_mx_ref[...] = qs.astype(q_mx_ref.dtype)       # bf16 feed for the MXU
        acc_ref[...] = jnp.zeros_like(acc_ref)

    ks = _normalize_scale(k_ref[...]).astype(q_mx_ref.dtype)

    # sim / T for this tile: contract feature dims directly (A @ B^T on the
    # MXU without materializing a transpose), f32 accumulation.
    sim_t = lax.dot_general(
        q_mx_ref[...], ks,
        dimension_numbers=(((1,), (1,)), ((), ())),
        preferred_element_type=jnp.float32,
    )

    # exp((sim - 1)/T): shifted by the known maximum (cosine sim <= 1) so that
    # small temperatures cannot overflow float32.
    e = jnp.exp(sim_t - inv_temp)
    acc_ref[...] += jnp.sum(e, axis=1, keepdims=True)

    # Drop the self-similarity term; only diagonal tiles contain it.
    @pl.when(qi == kj)
    def _drop_diag():
        rr = lax.broadcasted_iota(jnp.int32, (tile, tile), 0)
        cc = lax.broadcasted_iota(jnp.int32, (tile, tile), 1)
        diag = jnp.sum(jnp.where(rr == cc, e, 0.0), axis=1, keepdims=True)
        acc_ref[...] -= diag

    @pl.when(kj == pl.num_programs(1) - 1)
    def _finalize():
        # loss_row = -log( exp(pos/T) / sum_{j != i} exp(sim_ij / T) )
        #          = log(acc) + 1/T - pos/T        with acc = sum exp((sim-1)/T)
        loss_ref[...] = (jnp.log(acc_ref[...]) + inv_temp
                         - post_ref[...]).astype(loss_ref.dtype)


def _pick_row_tile(b, dp, vmem_budget=40 * 1024 * 1024):
    """Largest square tile that divides B (each tile stays in one half) and
    keeps the double-buffered streams + scratch under the VMEM budget
    (sized for v7x's 64 MiB physical VMEM, with headroom)."""
    for t in (512, 256, 128, 64, 32, 16, 8):
        if b % t:
            continue
        est = 6 * t * dp * 4 + t * dp * 2 + 2 * t * t * 4 + 16 * t
        if est <= vmem_budget:
            return t
    # TODO(synk): support batch sizes that are not a multiple of 8 (needs
    # masked padding of the row axis so padded rows do not pollute denominators).
    raise ValueError(f"batch_size must be a multiple of 8, got {b}")


def contrastive_loss(z_i, z_j, temperature=0.5, *, matmul_dtype=jnp.bfloat16):
    """SimCLR NT-Xent loss. z_i, z_j: (B, D). Returns scalar float32 loss."""
    b, d = z_i.shape
    assert z_j.shape == (b, d)
    n = 2 * b

    # Lane-dense feature dim: zero-pad D to a multiple of 128 (norms and dot
    # products are unchanged).
    dp = ((d + 127) // 128) * 128
    if dp != d:
        z_i = jnp.pad(z_i, ((0, 0), (0, dp - d)))
        z_j = jnp.pad(z_j, ((0, 0), (0, dp - d)))

    # reps = [z_i; z_j] laid out once in HBM (layout plumbing only); the kernel
    # streams tiles of it directly, never building a concat in VMEM.
    reps = jnp.concatenate([z_i, z_j], axis=0).astype(jnp.float32)  # (2B, Dp)

    t = _pick_row_tile(b, dp)
    n_tiles = n // t
    n_half = n_tiles // 2

    kernel = functools.partial(_nt_xent_kernel, tile=t,
                               temperature=float(temperature))

    row_map = lambda qi, kj: (qi, 0)
    partner_map = lambda qi, kj: ((qi + n_half) % n_tiles, 0)
    col_map = lambda qi, kj: (kj, 0)

    per_row = pl.pallas_call(
        kernel,
        out_shape=jax.ShapeDtypeStruct((n, 1), jnp.float32),
        grid_spec=pltpu.PrefetchScalarGridSpec(
            num_scalar_prefetch=0,
            grid=(n_tiles, n_tiles),            # reduction (columns) is last
            in_specs=[
                pl.BlockSpec((t, dp), row_map),      # rows of this row tile
                pl.BlockSpec((t, dp), partner_map),  # partner half (positives)
                pl.BlockSpec((t, dp), col_map),      # streamed column tiles
            ],
            out_specs=pl.BlockSpec((t, 1), lambda qi, kj: (qi, 0)),
            scratch_shapes=[
                pltpu.VMEM((t, dp), matmul_dtype),   # normalized/scaled rows
                pltpu.VMEM((t, 1), jnp.float32),     # positives / T
                pltpu.VMEM((t, 1), jnp.float32),     # denominator accumulator
            ],
        ),
        compiler_params=pltpu.CompilerParams(
            dimension_semantics=("parallel", "arbitrary"),
            vmem_limit_bytes=48 * 1024 * 1024,
        ),
    )(reps, reps, reps)

    return jnp.sum(per_row) / jnp.float32(n)


def _reference_loss(z_i, z_j, temperature=0.5):
    """Pure-JAX f32 reference mirroring the PyTorch module."""
    b = z_i.shape[0]
    eps = 1e-12

    def norm(x):
        return x / jnp.maximum(jnp.sqrt(jnp.sum(x * x, axis=1, keepdims=True)), eps)

    reps = jnp.concatenate([norm(z_i), norm(z_j)], axis=0)
    sim = reps @ reps.T
    n = 2 * b
    pos = jnp.concatenate(
        [jnp.diagonal(sim, offset=b), jnp.diagonal(sim, offset=-b)])
    nominator = jnp.exp(pos / temperature)
    mask = 1.0 - jnp.eye(n, dtype=jnp.float32)
    denominator = jnp.sum(mask * jnp.exp(sim / temperature), axis=1)
    return jnp.sum(-jnp.log(nominator / denominator)) / n


if __name__ == "__main__":
    key = jax.random.PRNGKey(0)
    k1, k2 = jax.random.split(key)
    B, D = 8, 32  # small shapes: batch=8, hidden=32
    z_i = jax.random.normal(k1, (B, D), dtype=jnp.float32)
    z_j = jax.random.normal(k2, (B, D), dtype=jnp.float32)

    ref = jax.block_until_ready(_reference_loss(z_i, z_j, temperature=0.5))

    # Exact-logic check: f32 MXU feed must match the f32 reference tightly.
    loss_f32 = jax.block_until_ready(
        contrastive_loss(z_i, z_j, 0.5, matmul_dtype=jnp.float32))
    assert jnp.allclose(loss_f32, ref, rtol=1e-5, atol=1e-5), (loss_f32, ref)

    # Default fast path: bf16 MXU feed (f32 accumulation) — bf16-level tolerance.
    loss_bf16 = jax.block_until_ready(contrastive_loss(z_i, z_j, 0.5))
    assert jnp.allclose(loss_bf16, ref, rtol=1e-2, atol=1e-2), (loss_bf16, ref)

    print("KERNEL_OK")
</pallas_src>

<mosaic_0001>
module attributes {stable_mosaic.version = 11 : i64} {
  func.func @_nt_xent_kernel(%arg0: i32, %arg1: i32, %arg2: memref<8x128xf32, #tpu.memory_space<vmem>>, %arg3: memref<8x128xf32, #tpu.memory_space<vmem>>, %arg4: memref<8x128xf32, #tpu.memory_space<vmem>>, %arg5: memref<8x1xf32, #tpu.memory_space<vmem>>, %arg6: memref<8x128xf32, #tpu.memory_space<vmem>>, %arg7: memref<8x1xf32, #tpu.memory_space<vmem>>, %arg8: memref<8x1xf32, #tpu.memory_space<vmem>>) attributes {dimension_semantics = [#tpu.dimension_semantics<parallel>, #tpu.dimension_semantics<arbitrary>], iteration_bounds = array<i64: 2, 2>, scalar_prefetch = 0 : i64, scratch_operands = 3 : i64, tpu.core_type = #tpu.core_type<tc>, window_params = [{transform_indices = @transform_0, window_bounds = array<i64: 8, 128>}, {transform_indices = @transform_1, window_bounds = array<i64: 8, 128>}, {transform_indices = @transform_2, window_bounds = array<i64: 8, 128>}, {transform_indices = @transform_3, window_bounds = array<i64: 8, 1>}]} {
    %c0_i32 = arith.constant 0 : i32
    %0 = arith.cmpi eq, %arg1, %c0_i32 : i32
    %1 = arith.extui %0 : i1 to i32
    %cst = arith.constant 1.000000e-24 : f32
    %c0_i32_0 = arith.constant 0 : i32
    %2 = arith.cmpi ne, %1, %c0_i32_0 : i32
    scf.if %2 {
      %c0_16 = arith.constant 0 : index
      %c0_17 = arith.constant 0 : index
      %30 = vector.load %arg2[%c0_16, %c0_17] : memref<8x128xf32, #tpu.memory_space<vmem>>, vector<8x128xf32>
      %31 = arith.mulf %30, %30 : vector<8x128xf32>
      %cst_18 = arith.constant dense<0.000000e+00> : vector<8xf32>
      %32 = vector.multi_reduction <add>, %31, %cst_18 [1] : vector<8x128xf32> to vector<8xf32>
      %33 = vector.shape_cast %32 : vector<8xf32> to vector<8x1xf32>
      %34 = vector.broadcast %cst : f32 to vector<8x1xf32>
      %35 = arith.maximumf %33, %34 : vector<8x1xf32>
      %36 = math.rsqrt %35 : vector<8x1xf32>
      %cst_19 = arith.constant 1.41421354 : f32
      %37 = vector.broadcast %cst_19 : f32 to vector<8x1xf32>
      %38 = arith.mulf %36, %37 : vector<8x1xf32>
      %39 = vector.broadcast %38 : vector<8x1xf32> to vector<8x128xf32>
      %40 = arith.mulf %30, %39 : vector<8x128xf32>
      %c0_20 = arith.constant 0 : index
      %c0_21 = arith.constant 0 : index
      %41 = vector.load %arg3[%c0_20, %c0_21] : memref<8x128xf32, #tpu.memory_space<vmem>>, vector<8x128xf32>
      %42 = arith.mulf %41, %41 : vector<8x128xf32>
      %cst_22 = arith.constant dense<0.000000e+00> : vector<8xf32>
      %43 = vector.multi_reduction <add>, %42, %cst_22 [1] : vector<8x128xf32> to vector<8xf32>
      %44 = vector.shape_cast %43 : vector<8xf32> to vector<8x1xf32>
      %45 = vector.broadcast %cst : f32 to vector<8x1xf32>
      %46 = arith.maximumf %44, %45 : vector<8x1xf32>
      %47 = math.rsqrt %46 : vector<8x1xf32>
      %cst_23 = arith.constant 1.41421354 : f32
      %48 = vector.broadcast %cst_23 : f32 to vector<8x1xf32>
      %49 = arith.mulf %47, %48 : vector<8x1xf32>
      %50 = vector.broadcast %49 : vector<8x1xf32> to vector<8x128xf32>
      %51 = arith.mulf %41, %50 : vector<8x128xf32>
      %52 = arith.mulf %40, %51 : vector<8x128xf32>
      %cst_24 = arith.constant dense<0.000000e+00> : vector<8xf32>
      %53 = vector.multi_reduction <add>, %52, %cst_24 [1] : vector<8x128xf32> to vector<8xf32>
      %54 = vector.shape_cast %53 : vector<8xf32> to vector<8x1xf32>
      %c0_25 = arith.constant 0 : index
      %c0_26 = arith.constant 0 : index
      %55 = vector.load %arg7[%c0_25, %c0_26] : memref<8x1xf32, #tpu.memory_space<vmem>>, vector<8x1xf32>
      tpu.vector_store %arg7[%c0_25, %c0_26], %54 {strides = array<i32>} : memref<8x1xf32, #tpu.memory_space<vmem>>, vector<8x1xf32>,
      %c0_27 = arith.constant 0 : index
      %c0_28 = arith.constant 0 : index
      %56 = vector.load %arg6[%c0_27, %c0_28] : memref<8x128xf32, #tpu.memory_space<vmem>>, vector<8x128xf32>
      tpu.vector_store %arg6[%c0_27, %c0_28], %40 {strides = array<i32>} : memref<8x128xf32, #tpu.memory_space<vmem>>, vector<8x128xf32>,
      %cst_29 = arith.constant 0.000000e+00 : f32
      %57 = vector.broadcast %cst_29 : f32 to vector<8x1xf32>
      %c0_30 = arith.constant 0 : index
      %c0_31 = arith.constant 0 : index
      %58 = vector.load %arg8[%c0_30, %c0_31] : memref<8x1xf32, #tpu.memory_space<vmem>>, vector<8x1xf32>
      tpu.vector_store %arg8[%c0_30, %c0_31], %57 {strides = array<i32>} : memref<8x1xf32, #tpu.memory_space<vmem>>, vector<8x1xf32>,
    } else {
    }
    %c0 = arith.constant 0 : index
    %c0_1 = arith.constant 0 : index
    %3 = vector.load %arg4[%c0, %c0_1] : memref<8x128xf32, #tpu.memory_space<vmem>>, vector<8x128xf32>
    %4 = arith.mulf %3, %3 : vector<8x128xf32>
    %cst_2 = arith.constant dense<0.000000e+00> : vector<8xf32>
    %5 = vector.multi_reduction <add>, %4, %cst_2 [1] : vector<8x128xf32> to vector<8xf32>
    %6 = vector.shape_cast %5 : vector<8xf32> to vector<8x1xf32>
    %cst_3 = arith.constant 1.000000e-24 : f32
    %7 = vector.broadcast %cst_3 : f32 to vector<8x1xf32>
    %8 = arith.maximumf %6, %7 : vector<8x1xf32>
    %9 = math.rsqrt %8 : vector<8x1xf32>
    %cst_4 = arith.constant 1.41421354 : f32
    %10 = vector.broadcast %cst_4 : f32 to vector<8x1xf32>
    %11 = arith.mulf %9, %10 : vector<8x1xf32>
    %12 = vector.broadcast %11 : vector<8x1xf32> to vector<8x128xf32>
    %13 = arith.mulf %3, %12 : vector<8x128xf32>
    %c0_5 = arith.constant 0 : index
    %c0_6 = arith.constant 0 : index
    %14 = vector.load %arg6[%c0_5, %c0_6] : memref<8x128xf32, #tpu.memory_space<vmem>>, vector<8x128xf32>
    %cst_7 = arith.constant dense<0.000000e+00> : vector<8x8xf32>
    %15 = tpu.matmul %14, %13, %cst_7 {dimension_numbers = #tpu.dot_dimension_numbers<[1], [1], [0], [0], [0, 0, 1, 0], [], []>} : vector<8x128xf32>, vector<8x128xf32>, vector<8x8xf32> -> vector<8x8xf32>
    %cst_8 = arith.constant 2.000000e+00 : f32
    %16 = vector.broadcast %cst_8 : f32 to vector<8x8xf32>
    %17 = arith.subf %15, %16 : vector<8x8xf32>
    %18 = math.exp %17 : vector<8x8xf32>
    %c0_9 = arith.constant 0 : index
    %c0_10 = arith.constant 0 : index
    %19 = vector.load %arg8[%c0_9, %c0_10] : memref<8x1xf32, #tpu.memory_space<vmem>>, vector<8x1xf32>
    %cst_11 = arith.constant dense<0.000000e+00> : vector<8xf32>
    %20 = vector.multi_reduction <add>, %18, %cst_11 [1] : vector<8x8xf32> to vector<8xf32>
    %21 = vector.shape_cast %20 : vector<8xf32> to vector<8x1xf32>
    %22 = arith.addf %19, %21 : vector<8x1xf32>
    %c0_12 = arith.constant 0 : index
    %c0_13 = arith.constant 0 : index
    %23 = vector.load %arg8[%c0_12, %c0_13] : memref<8x1xf32, #tpu.memory_space<vmem>>, vector<8x1xf32>
    tpu.vector_store %arg8[%c0_12, %c0_13], %22 {strides = array<i32>} : memref<8x1xf32, #tpu.memory_space<vmem>>, vector<8x1xf32>,
    %24 = arith.cmpi eq, %arg0, %arg1 : i32
    %25 = arith.extui %24 : i1 to i32
    %c0_i32_14 = arith.constant 0 : i32
    %26 = arith.cmpi ne, %25, %c0_i32_14 : i32
    scf.if %26 {
      %30 = tpu.iota {dimensions = array<i32: 0>} : vector<8x8xi32>
      %31 = tpu.iota {dimensions = array<i32: 1>} : vector<8x8xi32>
      %32 = arith.cmpi eq, %30, %31 : vector<8x8xi32>
      %cst_16 = arith.constant 0.000000e+00 : f32
      %33 = vector.broadcast %cst_16 : f32 to vector<8x8xf32>
      %34 = arith.select %32, %18, %33 : vector<8x8xi1>, vector<8x8xf32>
      %cst_17 = arith.constant dense<0.000000e+00> : vector<8xf32>
      %35 = vector.multi_reduction <add>, %34, %cst_17 [1] : vector<8x8xf32> to vector<8xf32>
      %36 = vector.shape_cast %35 : vector<8xf32> to vector<8x1xf32>
      %c0_18 = arith.constant 0 : index
      %c0_19 = arith.constant 0 : index
      %37 = vector.load %arg8[%c0_18, %c0_19] : memref<8x1xf32, #tpu.memory_space<vmem>>, vector<8x1xf32>
      %38 = arith.subf %37, %36 : vector<8x1xf32>
      %c0_20 = arith.constant 0 : index
      %c0_21 = arith.constant 0 : index
      %39 = vector.load %arg8[%c0_20, %c0_21] : memref<8x1xf32, #tpu.memory_space<vmem>>, vector<8x1xf32>
      tpu.vector_store %arg8[%c0_20, %c0_21], %38 {strides = array<i32>} : memref<8x1xf32, #tpu.memory_space<vmem>>, vector<8x1xf32>,
    } else {
    }
    %c1_i32 = arith.constant 1 : i32
    %27 = arith.cmpi eq, %arg1, %c1_i32 : i32
    %28 = arith.extui %27 : i1 to i32
    %c0_i32_15 = arith.constant 0 : i32
    %29 = arith.cmpi ne, %28, %c0_i32_15 : i32
    scf.if %29 {
      %c0_16 = arith.constant 0 : index
      %c0_17 = arith.constant 0 : index
      %30 = vector.load %arg8[%c0_16, %c0_17] : memref<8x1xf32, #tpu.memory_space<vmem>>, vector<8x1xf32>
      %31 = math.log %30 : vector<8x1xf32>
      %cst_18 = arith.constant 2.000000e+00 : f32
      %32 = vector.broadcast %cst_18 : f32 to vector<8x1xf32>
      %33 = arith.addf %31, %32 : vector<8x1xf32>
      %c0_19 = arith.constant 0 : index
      %c0_20 = arith.constant 0 : index
      %34 = vector.load %arg7[%c0_19, %c0_20] : memref<8x1xf32, #tpu.memory_space<vmem>>, vector<8x1xf32>
      %35 = arith.subf %33, %34 : vector<8x1xf32>
      %c0_21 = arith.constant 0 : index
      %c0_22 = arith.constant 0 : index
      %36 = vector.load %arg5[%c0_21, %c0_22] : memref<8x1xf32, #tpu.memory_space<vmem>>, vector<8x1xf32>
      tpu.vector_store %arg5[%c0_21, %c0_22], %35 {strides = array<i32>} : memref<8x1xf32, #tpu.memory_space<vmem>>, vector<8x1xf32>,
    } else {
    }
    return
  }
  func.func @transform_0(%arg0: i32, %arg1: i32) -> (i32, i32) {
    %c0_i32 = arith.constant 0 : i32
    %c0_i32_0 = arith.constant 0 : i32
    return %arg0, %c0_i32 : i32, i32
  }
  func.func @transform_1(%arg0: i32, %arg1: i32) -> (i32, i32) {
    %c1_i32 = arith.constant 1 : i32
    %0 = arith.addi %arg0, %c1_i32 : i32
    %c2_i32 = arith.constant 2 : i32
    %c0_i32 = arith.constant 0 : i32
    %1 = arith.cmpi eq, %c2_i32, %c0_i32 : i32
    %c1_i32_0 = arith.constant 1 : i32
    %2 = arith.select %1, %c1_i32_0, %c2_i32 : i32
    %3 = arith.remsi %0, %2 : i32
    %c0_i32_1 = arith.constant 0 : i32
    %4 = arith.cmpi ne, %3, %c0_i32_1 : i32
    %c0_i32_2 = arith.constant 0 : i32
    %5 = arith.cmpi slt, %3, %c0_i32_2 : i32
    %c0_i32_3 = arith.constant 0 : i32
    %6 = arith.cmpi slt, %2, %c0_i32_3 : i32
    %7 = arith.xori %5, %6 : i1
    %8 = arith.andi %7, %4 : i1
    %9 = arith.addi %3, %2 : i32
    %10 = arith.select %8, %9, %3 : i32
    %c0_i32_4 = arith.constant 0 : i32
    %c0_i32_5 = arith.constant 0 : i32
    return %10, %c0_i32_4 : i32, i32
  }
  func.func @transform_2(%arg0: i32, %arg1: i32) -> (i32, i32) {
    %c0_i32 = arith.constant 0 : i32
    %c0_i32_0 = arith.constant 0 : i32
    return %arg1, %c0_i32 : i32, i32
  }
  func.func @transform_3(%arg0: i32, %arg1: i32) -> (i32, i32) {
    %c0_i32 = arith.constant 0 : i32
    %c0_i32_0 = arith.constant 0 : i32
    return %arg0, %c0_i32 : i32, i32
  }
}

</mosaic_0001>

<bundles_post_ra>
// kernel: tpu_custom_call.1
= control target key start
LH: loop header
LB: loop body
LE: loop exit
PB: predicated region body
PF: predicated region fallthrough
CT: control target
= control target key end

     0   :  { %s1312_s0 = inlined_call_operand.hbm [shape: f32[16,128], index: 0, kind: input, shape index: {}]   ;;  %s1313_s1 = inlined_call_operand.hbm [shape: f32[16,128], index: 1, kind: input, shape index: {}]   ;;  %s1314_s2 = inlined_call_operand.hbm [shape: f32[16,128], index: 2, kind: input, shape index: {}]   ;;  %s1315_s3 = inlined_call_operand.vmem [shape: f32[16,1], index: 3, kind: output, shape index: {}]  }
   0x1   :  { %1328 = sst [smem:[#allocation17_spill]] %s1313_s1 }
   0x2   :  { %1329 = sst [smem:[#allocation18_spill]] %s1314_s2 }
   0x3   :  { %1330 = sst [smem:[#allocation19_spill]] %s1315_s3 }
   0x4   :  { %8 = vsyncpa [#allocation6], 0 }
   0x5   :  { %10 = vsyncpa [#allocation6 + $0x1], 0 }
   0x6   :  { %11 = vsyncpa [#allocation8], 0 }
   0x7   :  { %13 = vsyncpa [#allocation8 + $0x1], 0  ;;  %s997_s12 = smov 0   ;;  %s999_s13 = smov 0  }
   0x8   :  { %s1001_s14 = smov 0   ;;  %s1003_s15 = smov 0  }
   0x9   :  { %s1005_s16 = smov 0   ;;  %s1007_s17 = smov 0  }
   0xa   :  { %s1009_s18 = smov 0   ;;  %s1011_s19 = smov 0  }
   0xb   :  { %s1013_s20 = smov 0   ;;  %s1015_s21 = smov 0  }
   0xc   :  { %s1017_s22 = smov 0   ;;  %s1019_s23 = smov 0  }
   0xd   :  { %s1021_s24 = smov 0   ;;  %s1023_s25 = smov 0  }
   0xe LB: > { %1331 = sst [smem:[#allocation13_spill]] %s933_s16  ;;  %s1316_s26 = sadd.s32 4294967295, %s969_s25   ;;  %s969_s25 = sphi %s1023_s25, %s19_s25   ;;  %s965_s24 = sphi %s1021_s24, %s1378_s24   ;;  %s961_s23 = sphi %s1019_s23, %s1377_s23   ;;  %s957_s22 = sphi %s1017_s22, %s1376_s22   ;;  %s953_s21 = sphi %s1015_s21, %s1375_s21   ;;  %s949_s20 = sphi %s1013_s20, %s1374_s20   ;;  %s945_s19 = sphi %s1011_s19, %s1373_s19   ;;  %s941_s18 = sphi %s1009_s18, %s1372_s18   ;;  %s937_s17 = sphi %s1007_s17, %s1371_s17   ;;  %s933_s16 = sphi %s1005_s16, %s1370_s16   ;;  %s929_s15 = sphi %s1003_s15, %s1365_s15   ;;  %s925_s14 = sphi %s1001_s14, %s1369_s14   ;;  %s921_s13 = sphi %s999_s13, %s1368_s13   ;;  %s917_s12 = sphi %s997_s12, %s1367_s12  }
   0xf   : > { %1332 = sst [smem:[#allocation14_spill]] %s953_s21  ;;  %s1317_s27 = sadd.s32 1, %s961_s23 }
  0x10   : > { %1333 = sst [smem:[#allocation15_spill]] %s957_s22  ;;  %p1071_p0 = scmp.ge.s32.totalorder %s1317_s27, 2 }
  0x11   : > { %s31_s29 = sadd.s32 1, %s965_s24  ;;  %p1323_p1 = scmp.eq.s32.totalorder %s969_s25, 0 }
  0x12   : > { %s1334_s28 = scalar_select %p1071_p0, 1, 0 }
  0x13   : > { %p1079_p2 = scmp.eq.s32.totalorder %s1316_s26, 0  ;;  %s63_s5 = ssub.s32 0, %s31_s29 }
  0x14   : > { %s32_s4 = scalar_select %p1071_p0, %s31_s29, %s965_s24 }
  0x15   : > { %s1335_s30 = scalar_select %p1079_p2, 1, 0 }
  0x16   : > { %p33_p3 = scmp.ge.s32.totalorder %s32_s4, 2  ;;  %s586_s6 = smin.u32 %s63_s5, %s31_s29 }
  0x17   : > { %s65_s7 = sand.u32 1, %s586_s6   ;;  %s90_s8 = sadd.s32 1, %s937_s17 }
  0x18   : > { %s1380_s4 = smov (%p33_p3, %s32_s4), 0  ;;  %p97_p4 = scmp.ne.s32.totalorder %s937_s17, %s933_s16 }
  0x19   : > { %s74_s9 = sadd.s32 1, %s1380_s4  ;;  %p588_p6 = scmp.lt.s32.totalorder %s65_s7, 0 }
  0x1a   : > { %p1094_p5 = por %p97_p4, %p1323_p1  ;;  %s72_s11 = sadd.s32 2, %s65_s7 }
  0x1b   : > { %s76_s26 = ssub.s32 0, %s74_s9  ;;  %s1382_s11 = smov (!%p588_p6, %s72_s11), %s65_s7 }
  0x1c   : > { %s589_s27 = smin.u32 %s76_s26, %s74_s9  ;;  %p103_p7 = scmp.ne.s32.totalorder %s933_s16, %s929_s15 }
  0x1d   : > { %s78_s29 = sand.u32 1, %s589_s27   ;;  %p1322_p9 = scmp.lt.s32.totalorder %s969_s25, 4 }
  0x1e   : > { %p1102_p8 = por %p103_p7, %p1079_p2  ;;  %s197_s6 = sand.u32 1, %s969_s25  }
  0x1f   : > { %p591_p10 = scmp.lt.s32.totalorder %s78_s29, 0  ;;  %s85_s21 = sadd.s32 2, %s78_s29 }
  0x20   : > { %s1337_s5 = scalar_select %p1102_p8, 1, 0 }
  0x21   : > { %s199_s3 = sand.u32 1, %s937_s17   ;;  %s1384_s21 = smov (!%p591_p10, %s85_s21), %s78_s29 }
  0x22   : > { %1338 = sst [smem:[#allocation16_spill]] %s1337_s5  ;;  %s596_s22 = sshll.u32 %s199_s3, 3 }
  0x23   : > { %s600_s2 = sshll.u32 %s1382_s11, 7  ;;  %s87_s7 = ssub.s32 %s1382_s11, %s1384_s21 }
  0x24   : > { %p88_p11 = scmp.eq.s32.totalorder %s87_s7, 0  ;;  %s1339_s1 = sld [smem:[#allocation17_spill]] }
  0x25   : > { %s201_s9 = scalar_lea.vmem [#allocation7], %s596_s22  ;;  %p1118_p12 = pnand %p1322_p9, %p1094_p5 }
  0x26   : > { %s221_s5 = sshll.u32 %s201_s9, 4  ;;  %s1125_s21 = scalar_lea.sflag [#allocation8], %s197_s6  ;;  %s222_s5 = int_to_ptr.vmem [resolvable:$true] %s221_s5 }
  0x27   : > { %s1123_s3 = scalar_select %p88_p11, %s937_s17, %s90_s8  }
  0x28   : > { %p765_p3 = pneg %p1118_p12 }
  0x2a   : > { %s1112_s27 = scalar_lea.hbm %s1339_s1, %s600_s2  ;;  %s768_s10 = scalar_lea.hbm %s1339_s1, 256 }
  0x2b   : > { %s763_s11 = scalar_lea.hbm %s1112_s27, 128  ;;  %p769_p5 = scmp.lt.s32.totalorder %s1112_s27, %s1339_s1 }
  0x2c   : > { %p764_p13 = scmp.ne.s32.totalorder %s1112_s27, %s763_s11  ;;  %p770_p7 = scmp.lt.s32.totalorder %s768_s10, %s763_s11 }
  0x2e   : > { %p766_p4 = pnand %p765_p3, %p764_p13  ;;  %p771_p10 = por %p770_p7, %p769_p5 }
  0x30   : > { %p767_p6 = pneg %p766_p4 }
  0x32   : > { %p772_p11 = pnand %p771_p10, %p767_p6 }
  0x34   : > { %775 = shalt.err (!%p772_p11)
}
  0x35   : > { %s776_s8 = scalar_lea.vmem %s222_s5, 128  ;;  %s971_s6 = smov [#allocation7]  }
  0x36   : > { %p777_p9 = scmp.ne.s32.totalorder %s222_s5, %s776_s8  ;;  %s781_s15 = sshll.u32 %s971_s6, 4  ;;  %s782_s15 = int_to_ptr.vmem [resolvable:$false] %s781_s15 }
  0x37   : > { %s783_s26 = scalar_lea.vmem %s782_s15, 256  ;;  %p784_p13 = scmp.lt.s32.totalorder %s222_s5, %s782_s15 }
  0x38   : > { %p779_p1 = pnand %p777_p9, %p765_p3  ;;  %p785_p4 = scmp.lt.s32.totalorder %s783_s26, %s776_s8 }
  0x3a   : > { %p780_p8 = pneg %p779_p1  ;;  %p786_p0 = por %p785_p4, %p784_p13 }
  0x3c   : > { %p787_p2 = pnand %p786_p0, %p780_p8 }
  0x3e   : > { %790 = shalt.err (!%p787_p2)
}
  0x3f   : > { %633 = dma.hbm_to_vmem [thread:$0]  (!%p1118_p12), %s1112_s27, 128, %s222_s5, %s1125_s21  }
  0x40   : > { %p603_p0 = scmp.ge.s32.totalorder %s969_s25, 1  ;;  %p244_p1 = scmp.lt.s32.totalorder %s969_s25, 5 }
  0x41   : > { %s35_s9 = ssub.s32 %s965_s24, %s1380_s4  ;;  %s38_s11 = sadd.s32 1, %s949_s20 }
  0x42   : > { %p1144_p2 = pnand %p603_p0, %p244_p1  ;;  %p36_p8 = scmp.eq.s32.totalorder %s35_s9, 0 }
  0x43   : > { %p45_p9 = scmp.ne.s32.totalorder %s949_s20, %s945_s19  ;;  %p51_p3 = scmp.ne.s32.totalorder %s945_s19, %s941_s18 }
  0x44   : > { %s1156_s2 = scalar_select %p36_p8, %s949_s20, %s38_s11  }
  0x45   : > { %p1342_p6 = scmp.eq.s32.totalorder %s969_s25, 0  ;;  %p1343_p7 = scmp.ne.s32.totalorder %s1335_s30, 0 }
  0x46   : > { %s179_s5 = sand.u32 1, %s949_s20   ;;  %s595_s27 = sshll.u32 %s965_s24, 7 }
  0x47   : > { %p47_p5 = por %p1342_p6, %p45_p9  ;;  %p1162_p10 = por %p1343_p7, %p51_p3 }
  0x48   : > { %s594_s10 = sshll.u32 %s179_s5, 3  ;;  %s188_s8 = scalar_lea.hbm %s1312_s0, %s595_s27 }
  0x49   : > { %s183_s6 = scalar_lea.vmem [#allocation5], %s594_s10  ;;  %p1345_p12 = scmp.lt.s32.totalorder %s969_s25, 4 }
  0x4a   : > { %s190_s15 = sshll.u32 %s183_s6, 4  ;;  %s180_s26 = scalar_lea.sflag [#allocation6], %s179_s5  ;;  %s191_s15 = int_to_ptr.vmem [resolvable:$true] %s190_s15 }
  0x4b   : > { %p1173_p11 = pnand %p1345_p12, %p47_p5  ;;  %s804_s9 = scalar_lea.vmem %s191_s15, 128 }
  0x4c   : > { %p805_p4 = scmp.ne.s32.totalorder %s191_s15, %s804_s9  ;;  %s972_s11 = smov [#allocation5]  }
  0x4d   : > { %p793_p13 = pneg %p1173_p11  ;;  %s809_s1 = sshll.u32 %s972_s11, 4  ;;  %s810_s1 = int_to_ptr.vmem [resolvable:$false] %s809_s1 }
  0x4e   : > { %s811_s27 = scalar_lea.vmem %s810_s1, 256  ;;  %p812_p8 = scmp.lt.s32.totalorder %s191_s15, %s810_s1 }
  0x4f   : > { %p807_p0 = pnand %p805_p4, %p793_p13  ;;  %p813_p9 = scmp.lt.s32.totalorder %s811_s27, %s804_s9 }
  0x51   : > { %p808_p1 = pneg %p807_p0  ;;  %p814_p3 = por %p813_p9, %p812_p8 }
  0x53   : > { %p815_p6 = pnand %p814_p3, %p808_p1 }
  0x55   : > { %818 = shalt.err (!%p815_p6)
}
  0x56   : > { %630 = dma.hbm_to_vmem [thread:$0]  (!%p1173_p11), %s188_s8, 128, %s191_s15, %s180_s26  }
  0x57   : > { %s1347_s1 = sadd.s32 1, %s961_s23  ;;  %p1348_p5 = scmp.ne.s32.totalorder %s1334_s28, 0 }
  0x58   : > { %s116_s5 = sadd.s32 1, %s925_s14  ;;  %p123_p12 = scmp.ne.s32.totalorder %s925_s14, %s921_s13 }
  0x59   : > { %s1386_s1 = smov (%p1348_p5, %s1347_s1), 0  ;;  %p129_p13 = scmp.ne.s32.totalorder %s921_s13, %s917_s12 }
  0x5a   : > { %s113_s10 = ssub.s32 %s961_s23, %s1386_s1  ;;  %p1349_p0 = scmp.eq.s32.totalorder %s969_s25, 0 }
  0x5b   : > { %p114_p4 = scmp.eq.s32.totalorder %s113_s10, 0  ;;  %p1198_p8 = por %p129_p13, %p1343_p7 }
  0x5c   : > { %p125_p1 = por %p123_p12, %p1349_p0  ;;  %s230_s7 = sand.u32 1, %s925_s14  }
  0x5d   : > { %s1204_s8 = scalar_select %p114_p4, %s925_s14, %s116_s5  }
  0x5e   : > { %s601_s28 = sshll.u32 %s230_s7, 3  ;;  %s602_s6 = sshll.u32 %s961_s23, 7 }
  0x5f   : > { %s1351_s26 = sld [smem:[#allocation18_spill]]  ;;  %s232_s11 = scalar_lea.vmem [#allocation9], %s601_s28 }
  0x60   : > { %s239_s27 = sshll.u32 %s232_s11, 4  ;;  %p1352_p11 = scmp.lt.s32.totalorder %s969_s25, 4  ;;  %s240_s27 = int_to_ptr.vmem [resolvable:$true] %s239_s27 }
  0x61   : > { %s832_s30 = scalar_lea.vmem %s240_s27, 128  ;;  %s973_s5 = smov [#allocation9]  }
  0x62   : > { %p1212_p9 = pnand %p1352_p11, %p125_p1  ;;  %p833_p3 = scmp.ne.s32.totalorder %s240_s27, %s832_s30 }
  0x63   : > { %s837_s10 = sshll.u32 %s973_s5, 4  ;;  %s838_s10 = int_to_ptr.vmem [resolvable:$false] %s837_s10 }
  0x64   : > { %p821_p7 = pneg %p1212_p9  ;;  %s839_s7 = scalar_lea.vmem %s838_s10, 256 }
  0x65   : > { %s237_s9 = scalar_lea.hbm %s1351_s26, %s602_s6  ;;  %p840_p12 = scmp.lt.s32.totalorder %s240_s27, %s838_s10 }
  0x66   : > { %p835_p6 = pnand %p833_p3, %p821_p7  ;;  %p841_p13 = scmp.lt.s32.totalorder %s839_s7, %s832_s30 }
  0x68   : > { %p836_p5 = pneg %p835_p6  ;;  %p842_p4 = por %p841_p13, %p840_p12 }
  0x6a   : > { %p843_p0 = pnand %p842_p4, %p836_p5 }
  0x6c   : > { %846 = shalt.err (!%p843_p0)
}
  0x6d   : > { %636 = dma.hbm_to_vmem [thread:$0]  (!%p1212_p9), %s237_s9, 128, %s240_s27, %s1125_s21  }
  0x6e   : > { %248 = sbr.rel (%p1144_p2) target bundleno = 1151 (0x47f), region = 32  ;;  %s250_s28 = sand.u32 (!%p1144_p2), 1, %s945_s19  }
  0x6f   : > { %s604_s6 = sshll.u32 (!%p1144_p2), %s250_s28, 3  ;;  %s251_s15 = scalar_lea.sflag (!%p1144_p2), [#allocation6], %s250_s28 }
  0x70   : > { %s254_s18 = scalar_lea.vmem (!%p1144_p2), [#allocation5], %s604_s6 }
  0x73   : > { %904 = dma.done.wait (%p1162_p10), %s251_s15, 128  }
  0x74   : > { %906 = vsyncadd (%p1162_p10), %s251_s15, 4294967168  ;;  %s1354_s26 = sadd.s32 4294967295, %s969_s25   ;;  %s1355_s11 = sld [smem:[#allocation13_spill]] }
  0x75   : > { %s1356_s12 = sld [smem:[#allocation16_spill]]  ;;  %s259_s30 = sand.u32 1, %s1354_s26  }
  0x76   : > { %s260_s16 = scalar_lea.sflag [#allocation8], %s259_s30 }
  0x7a   : > { %s261_s21 = sand.u32 1, %s1355_s11  }
  0x7b   : > { %s605_s9 = sshll.u32 %s261_s21, 3  ;;  %p1357_p2 = scmp.ne.s32.totalorder %s1356_s12, 0 }
  0x7c   : > { %s263_s27 = scalar_lea.vmem [#allocation7], %s605_s9 }
  0x7d   : > { %908 = dma.done.wait (%p1357_p2), %s260_s16, 128  }
  0x7e   : > { %910 = vsyncadd (%p1357_p2), %s260_s16, 4294967168  ;;  %s270_s5 = sand.u32 1, %s921_s13  }
  0x7f   : > { %s1236_s10 = sshll.u32 %s270_s5, 3 }
  0x80   : > { %s272_s22 = scalar_lea.vmem [#allocation9], %s1236_s10 }
  0x81   : > { %912 = dma.done.wait (%p1198_p8), %s260_s16, 128  }
  0x82   : > { %914 = vsyncadd (%p1198_p8), %s260_s16, 4294967168  ;;  %s1358_s7 = sld [smem:[#allocation15_spill]] }
  0x83   : > { %s1359_s26 = sld [smem:[#allocation19_spill]] }
  0x84   : > { %s1360_s12 = sld [smem:[#allocation14_spill]] }
  0x88   : > { %p317_p10 = scmp.lt.s32.totalorder %s1358_s7, 1 }
  0x8a   : > { %s1388_s7 = smov (!%p317_p10, %s1358_s7), 1  ;;  %p608_p1 = scmp.ne.s32.totalorder %s1360_s12, 0 }
  0x8b   : > { %s607_s28 = sshll.u32 %s1388_s7, 3 }
  0x8c   : > { %s1248_s11 = scalar_lea.vmem %s1359_s26, %s607_s28  ;;  %324 = sbr.rel (%p608_p1) target bundleno = 451 (0x1c3), region = 48 }
  0x91   : > { %v325_v0 = vld [vmem:[%s254_s18] sm:$0xff]  ;;  %v333_v1 = vld [vmem:[%s263_s27] sm:$0xff]  ;;  %vm344_vm0 = vcmask 7168   ;;  %v974_v4 = vmov 0.0  }
  0x92   : > { %v326_v2 = vmul.f32 %v325_v0, %v325_v0  ;;  %v334_v3 = vmul.f32 %v333_v1, %v333_v1  ;;  %347 = vst.msk [vmem:[#allocation4] sm:$0xff] %vm344_vm0, %v974_v4 }
  0x94   : > { %327 = vadd.xlane.f32.xlu0 %v326_v2 }
  0x98   : > { %335 = vadd.xlane.f32.xlu0 %v334_v3 }
 0x11d   : > { %v328_v5 = vpop.xlane.xlu0 %327 }
 0x11e   : > { %v329_v6 = vmax.f32 %v328_v5, 1e-24 }
 0x120   : > { %753 = vrsqrt.f32 %v329_v6 }
 0x121   : > { %v336_v7 = vpop.xlane.xlu0 %335 }
 0x122   : > { %v337_v8 = vmax.f32 %v336_v7, 1e-24 }
 0x124   : > { %755 = vrsqrt.f32 %v337_v8 }
 0x12d   : > { %v754_v9 = vpop.eup %753 }
 0x12e   : > { %v331_v10 = vmul.f32 1.4142135, %v754_v9 }
 0x130   : > { %v332_v11 = vmul.f32 %v331_v10, %v325_v0 }
 0x131   : > { %v756_v12 = vpop.eup %755 }
 0x132   : > { %v339_v13 = vmul.f32 1.4142135, %v756_v12  ;;  %346 = vst [vmem:[#allocation2] sm:$0xff] %v332_v11 }
 0x134   : > { %v340_v14 = vmul.f32 %v339_v13, %v333_v1 }
 0x136   : > { %v341_v15 = vmul.f32 %v340_v14, %v332_v11 }
 0x138   : > { %342 = vadd.xlane.f32.xlu1 %v341_v15 }
 0x1c1   : > { %v343_v16 = vpop.xlane.xlu1 %342 }
 0x1c2   : > { %345 = vst.msk [vmem:[#allocation3] sm:$0xff] %vm344_vm0, %v343_v16 }
 0x1c3 PF: > { %v348_v17 = vld [vmem:[%s272_s22] sm:$0xff]  ;;  %v975_v19 = vmov 0.0   ;;  %vm976_vm1 = vmmov 0   ;;  %vm431_vm2 = vcmask 64512   ;;  %v430_v32 = vld [vmem:[#allocation4] sm:$0xff]  ;;  %vm436_vm3 = vcmask 7168  }
 0x1c4   : > { %v349_v18 = vmul.f32 %v348_v17, %v348_v17  ;;  %616 = vmatprep.subr.mxu0 %v975_v19  ;;  %618 = vmatprep.mubr.msk.f32.mxu0 %vm976_vm1, %v975_v19  ;;  %v356_v25 = vld [vmem:[#allocation2] sm:$0xff]  ;;  %s1361_s29 = sld [smem:[#allocation14_spill]] }
 0x1c5   : > { %s1362_s18 = sld [smem:[#allocation15_spill]] }
 0x1c6   : > { %350 = vadd.xlane.f32.xlu0 %v349_v18 }
 0x1cb   : > { %p610_p8 = scmp.ne.s32.totalorder %s1362_s18, %s1361_s29 }
 0x24f   : > { %v351_v20 = vpop.xlane.xlu0 %350 }
 0x250   : > { %v352_v21 = vmax.f32 %v351_v20, 1e-24 }
 0x252   : > { %757 = vrsqrt.f32 %v352_v21 }
 0x25f   : > { %v758_v22 = vpop.eup %757 }
 0x260   : > { %v354_v23 = vmul.f32 1.4142135, %v758_v22 }
 0x262   : > { %v355_v24 = vmul.f32 %v354_v23, %v348_v17 }
 0x264   : > { %617 = vmatpush3.xpose.msra.mxu0 %v355_v24 }
 0x267   : > { %619 = vmatmul.mubr.f32.vlgmr.msra.gmra.mxu0 %v356_v25 }
 0x327   : > { %v423_v26 = vpop.f32.mrf.mxu0 }
 0x328   : > { %v609_v27 = vadd.f32 -2.0, %v423_v26 }
 0x329   : > { %v620_v28 = vpop.f32.mrf.mxu0 }
 0x32a   : > { %v428_v29 = vmul.f32 1.442695, %v609_v27 }
 0x32c   : > { %759 = vpow2.f32 %v428_v29 }
 0x339   : > { %v760_v30 = vpop.eup %759 }
 0x33a   : > { %v432_v31 = vsel %vm431_vm2, %v760_v30, 0.0 }
 0x33b   : > { %433 = vadd.xlane.f32.xlu0 %v432_v31 }
 0x3c3   : > { %441 = sbr.rel (%p610_p8) target bundleno = 1116 (0x45c), region = 52 }
 0x3c4   : > { %v434_v33 = vpop.xlane.xlu0 %433 }
 0x3c5   : > { %v435_v34 = vadd.f32 %v434_v33, %v430_v32 }
 0x3c7   : > { %437 = vst.msk [vmem:[#allocation4] sm:$0xff] %vm436_vm3, %v435_v34 }
 0x3c8   : > { %v442_v35 = vlaneseq }
 0x3ca   : > { %v443_v36 = vshrl.u32 %v442_v35, 7  ;;  %v445_v37 = vand.u32 127, %v442_v35 }
 0x3cc   : > { %vm446_vm4 = vcmp.eq.s32.totalorder %v443_v36, %v445_v37 }
 0x3cd   : > { %v447_v38 = vsel %vm446_vm4, %v760_v30, 0.0 }
 0x3ce   : > { %v448_v39 = vsel %vm431_vm2, %v447_v38, 0.0  ;;  %v451_v40 = vld [vmem:[#allocation4] sm:$0xff] }
 0x3cf   : > { %449 = vadd.xlane.f32.xlu0 %v448_v39 }
 0x458   : > { %v450_v41 = vpop.xlane.xlu0 %449 }
 0x459   : > { %v452_v42 = vsub.f32 %v451_v40, %v450_v41 }
 0x45b   : > { %453 = vst.msk [vmem:[#allocation4] sm:$0xff] %vm436_vm3, %v452_v42 }
 0x45c PF: > { %s1363_s30 = sld [smem:[#allocation14_spill]] }
 0x462   : > { %p611_p11 = scmp.ne.s32.totalorder %s1363_s30, 1 }
 0x464   : > { %457 = sbr.rel (%p611_p11) target bundleno = 1151 (0x47f), region = 56 }
 0x469   : > { %v458_v43 = vld [vmem:[#allocation4] sm:$0xff]  ;;  %v462_v46 = vld [vmem:[#allocation3] sm:$0xff] }
 0x46a   : > { %761 = vlog2.f32 %v458_v43 }
 0x477   : > { %v762_v44 = vpop.eup %761 }
 0x478   : > { %v460_v45 = vmul.f32 0.6931472, %v762_v44 }
 0x47a   : > { %v461_v47 = vadd.f32 2.0, %v460_v45 }
 0x47c   : > { %v463_v48 = vsub.f32 %v461_v47, %v462_v46 }
 0x47e   : > { %464 = vst.msk [vmem:[%s1248_s11] sm:$0xff] %vm436_vm3, %v463_v48 }
 0x47f PF: > { %s19_s25 = sadd.s32 1, %s969_s25   ;;  %s1365_s15 = sld [smem:[#allocation13_spill]] }
 0x480   : > { %p1265_p9 = scmp.ge.s32.totalorder %s19_s25, 6   ;;  %s1367_s12 = smov %s921_s13 }
 0x481   : > { %s1368_s13 = smov %s925_s14  ;;  %s1369_s14 = smov %s1204_s8 }
 0x482   : > { %s1370_s16 = smov %s937_s17  ;;  %s1371_s17 = smov %s1123_s3 }
 0x483   : > { %s1372_s18 = smov %s945_s19  ;;  %s1373_s19 = smov %s949_s20 }
 0x484   : > { %s1374_s20 = smov %s1156_s2  ;;  %s1375_s21 = smov %s961_s23 }
 0x485   : > { %s1376_s22 = smov %s965_s24  ;;  %s1377_s23 = smov %s1386_s1 }
 0x486   : > { %s1378_s24 = smov %s1380_s4  ;;  %18 = sbr.rel (!%p1265_p9) target bundleno = 14 (0xe), region = 108 }
 0x48b   :  { %484 = vsyncpa [#allocation6], 1 }
 0x48c   :  { %486 = vsyncpa [#allocation6 + $0x1], 1 }
 0x48d   :  { %487 = vsyncpa [#allocation8], 1 }
 0x48e   :  { %489 = vsyncpa [#allocation8 + $0x1], 1 }

</bundles_post_ra>
